<compile_context>
chip_gen: v7x
topology: tpu7x:2x2x1
jax: 0.10.0
libtpu: 0.0.40
codegen_flags: <defaults>
</compile_context>

<pallas_src>
import functools

import jax
import jax.numpy as jnp
from jax.experimental import pallas as pl
from jax.experimental.pallas import tpu as pltpu


# ----------------------------------------------------------------------------------
# Pallas kernel: transposed matmul + bias (+ optional ReLU)
#   out[N_out, M] = W[N_out, K] @ A[K, M] + bias[N_out, 1]
# ----------------------------------------------------------------------------------
def _mm_t_bias_act_kernel(w_ref, a_ref, bias_ref, o_ref, *, apply_relu):
    acc = jnp.dot(w_ref[...], a_ref[...], preferred_element_type=jnp.float32)
    acc = acc + bias_ref[...]                       # [N_out, 1] lane-broadcast, f32
    if apply_relu:
        acc = jnp.maximum(acc, 0.0)
    o_ref[...] = acc.astype(o_ref.dtype)


def _choose_tm(m):
    # Tiny maps: one grid step (per-step overhead ~0.35us dominates otherwise).
    # Real maps: 512-row-of-lanes tiles, keeps >= 2 parallel steps for megacore.
    return m if m <= 1024 else 512


def matmul_t_bias(w, a, bias, *, apply_relu):
    """w: [N_out, K] (bf16), a: [K, M] (bf16), bias: [N_out] -> [N_out, M] f32."""
    nout, k = w.shape
    m = a.shape[1]
    tm = _choose_tm(m)
    grid_m = pl.cdiv(m, tm)
    return pl.pallas_call(
        functools.partial(_mm_t_bias_act_kernel, apply_relu=apply_relu),
        out_shape=jax.ShapeDtypeStruct((nout, m), jnp.float32),
        grid=(grid_m,),
        in_specs=[
            pl.BlockSpec((nout, k), lambda i: (0, 0)),   # weight resident
            pl.BlockSpec((k, tm), lambda i: (0, i)),     # streamed, M on lanes
            pl.BlockSpec((nout, 1), lambda i: (0, 0)),   # bias resident
        ],
        out_specs=pl.BlockSpec((nout, tm), lambda i: (0, i)),   # lane-dense stores
        compiler_params=pltpu.CompilerParams(
            dimension_semantics=("parallel",)),
    )(w, a, bias.reshape(nout, 1).astype(jnp.float32))


# ----------------------------------------------------------------------------------
# JAX glue in channel-major [C, N, H, W] layout: im2col, bilinear deform sampling.
# ----------------------------------------------------------------------------------
def im2col_t(xc, k, pad):
    """xc: [C, N, H, W] -> [C*k*k, N*H*W] with row = c*k*k + tap (stride 1, dil 1)."""
    c, n, h, w = xc.shape
    xp = jnp.pad(xc, ((0, 0), (0, 0), (pad, pad), (pad, pad)))
    cols = [xp[:, :, i:i + h, j:j + w] for i in range(k) for j in range(k)]
    patches = jnp.stack(cols, axis=1)                # [C, KK, N, H, W]
    return patches.reshape(c * k * k, n * h * w)


def bilinear_sample_patches_t(xc, dy, dx, *, k, pad):
    """Deformable-conv sampling, channel-major.

    xc: [C, N, H, W]; dy, dx: [KK, N, H, W] per-tap offsets.
    Returns pre-weighted, PRE-SUMMED bilinear patches [C*KK, M] (row = c*KK + tap), so a
    single operand streams into the Pallas matmul instead of 8 (4 corners x val/weight).
    # TODO(synk): the data-dependent 4-corner gather itself stays as XLA take_along_axis;
    # a further step would precompute int corner indices + weights and do the gather +
    # matmul per M-tile inside a Pallas kernel (PrefetchScalarGridSpec / make_async_copy).
    """
    c, n, h, w = xc.shape
    kk = k * k
    hw = h * w
    m = n * hw

    hh = jnp.arange(h, dtype=jnp.float32).reshape(1, 1, h, 1)
    ww = jnp.arange(w, dtype=jnp.float32).reshape(1, 1, 1, w)
    ki = (jnp.arange(kk) // k).astype(jnp.float32).reshape(kk, 1, 1, 1)
    kj = (jnp.arange(kk) % k).astype(jnp.float32).reshape(kk, 1, 1, 1)
    py = hh - pad + ki + dy                          # [KK, N, H, W]
    px = ww - pad + kj + dx

    y0 = jnp.floor(py)
    x0 = jnp.floor(px)
    ly = py - y0
    lx = px - x0

    base = (jnp.arange(n, dtype=jnp.int32) * hw).reshape(1, n, 1, 1)
    x_flat = xc.reshape(c, m)                        # gather over flat (n, h, w)

    def corner(yc, xcoord, wgt):
        valid = (yc >= 0) & (yc <= h - 1) & (xcoord >= 0) & (xcoord <= w - 1)
        wgt = jnp.where(valid, wgt, 0.0)             # zero padding outside the map
        yi = jnp.clip(yc, 0, h - 1).astype(jnp.int32)
        xi = jnp.clip(xcoord, 0, w - 1).astype(jnp.int32)
        idx = (base + yi * w + xi).reshape(1, kk * m)
        v = jnp.take_along_axis(x_flat, jnp.broadcast_to(idx, (c, kk * m)), axis=1)
        return v * wgt.reshape(1, kk * m)            # pre-weight (broadcast over C), f32

    sampled = (corner(y0, x0, (1.0 - ly) * (1.0 - lx))
               + corner(y0, x0 + 1.0, (1.0 - ly) * lx)
               + corner(y0 + 1.0, x0, ly * (1.0 - lx))
               + corner(y0 + 1.0, x0 + 1.0, ly * lx))   # [C, KK*M]
    return sampled.reshape(c * kk, m)                # row = c*KK + tap (no transpose)


# ----------------------------------------------------------------------------------
# Module: SqueezeBlockWDeformConv
# ----------------------------------------------------------------------------------
def init_block_params(key, cin, cout, k):
    k1, k2, k3, k4 = jax.random.split(key, 4)
    off_w = jax.random.normal(k1, (2 * k * k, cin, k, k), jnp.float32) * 0.05
    off_b = jax.random.normal(k2, (2 * k * k,), jnp.float32) * 0.05
    scale = 1.0 / float(cin * k * k) ** 0.5
    w = jax.random.normal(k3, (cout, cin, k, k), jnp.float32) * scale
    b = jax.random.normal(k4, (cout,), jnp.float32) * 0.05
    return dict(off_w=off_w, off_b=off_b, w=w, b=b)


def init_squeeze_block(key, in_channels, channels, expand1x1_channels, expand3x3_channels):
    # NOTE: faithful to the original module, expand1x1 also uses expand3x3_channels.
    ks = jax.random.split(key, 3)
    return dict(
        squeeze=init_block_params(ks[0], in_channels, channels, 1),
        expand1x1=init_block_params(ks[1], channels, expand3x3_channels, 1),
        expand3x3=init_block_params(ks[2], channels, expand3x3_channels, 3),
    )


def prepare_params(params):
    """Assemble all fused matmul weight matrices / biases ONCE (parameter-only work)."""
    sq, e1, e3 = params["squeeze"], params["expand1x1"], params["expand3x3"]
    cin = sq["w"].shape[1]
    c_sq = sq["w"].shape[0]
    e1c = e1["w"].shape[0]
    e3c = e3["w"].shape[0]

    # squeeze offset conv (1x1): [2, Cin]
    w_off_sq = sq["off_w"].reshape(2, cin)
    # squeeze deform conv: [Csq, Cin]
    w_sq = sq["w"].reshape(c_sq, cin)

    # fused expand offset convs: [20, 9*Csq]; the 1x1 offset conv only reads the
    # centre tap (tap index 4) of the c-major/tap-minor im2col rows.
    w_off_e = jnp.zeros((2 + 18, c_sq * 9), jnp.float32)
    w_off_e = w_off_e.at[0:2, 4::9].set(e1["off_w"].reshape(2, c_sq))
    w_off_e = w_off_e.at[2:20, :].set(e3["off_w"].reshape(18, c_sq * 9))
    b_off_e = jnp.concatenate([e1["off_b"], e3["off_b"]])

    # fused expand deform convs (block-diagonal): [E1+E3, 10*Csq]
    w_e = jnp.zeros((e1c + e3c, 10 * c_sq), jnp.float32)
    w_e = w_e.at[:e1c, :c_sq].set(e1["w"].reshape(e1c, c_sq))
    w_e = w_e.at[e1c:, c_sq:].set(e3["w"].reshape(e3c, c_sq * 9))
    b_e = jnp.concatenate([e1["b"], e3["b"]])

    return dict(
        w_off_sq=w_off_sq.astype(jnp.bfloat16), b_off_sq=sq["off_b"],
        w_sq=w_sq.astype(jnp.bfloat16), b_sq=sq["b"],
        w_off_e=w_off_e.astype(jnp.bfloat16), b_off_e=b_off_e,
        w_e=w_e.astype(jnp.bfloat16), b_e=b_e,
    )


def squeeze_block_w_deform_conv(prep, x):
    """x: [N, Cin, H, W] (NCHW, PyTorch convention) -> [N, E1+E3, H, W]."""
    n, cin, h, w = x.shape
    m = n * h * w
    c_sq = prep["w_sq"].shape[0]
    cout = prep["w_e"].shape[0]

    # NCHW -> channel-major [Cin, N, H, W]: cheap leading-axis swap; bf16 once.
    xc = x.transpose(1, 0, 2, 3).astype(jnp.bfloat16)
    xT = xc.reshape(cin, m)

    # ---------------- squeeze block (k=1, pad=0) ----------------
    off_sq = matmul_t_bias(prep["w_off_sq"], xT, prep["b_off_sq"], apply_relu=False)  # [2, M]
    dy = off_sq[0:1].reshape(1, n, h, w)
    dx = off_sq[1:2].reshape(1, n, h, w)

    samp_sq = bilinear_sample_patches_t(xc, dy, dx, k=1, pad=0)                       # [Cin, M]
    sT = matmul_t_bias(prep["w_sq"], samp_sq.astype(jnp.bfloat16),
                       prep["b_sq"], apply_relu=True)                                 # [Csq, M] f32
    sc = sT.astype(jnp.bfloat16).reshape(c_sq, n, h, w)   # squeeze output, bf16 downstream

    # ---------------- fused expand offset convs (1x1 + 3x3, one matmul) ----------------
    # TODO(synk): for very large maps the [9*Csq, M] im2col operand could be avoided by
    # streaming sc through shifted BlockSpecs; Csq is small in squeeze blocks.
    patches3 = im2col_t(sc, 3, 1)                                                     # [9*Csq, M] bf16
    offs = matmul_t_bias(prep["w_off_e"], patches3, prep["b_off_e"],
                         apply_relu=False)                                            # [20, M]
    dy1 = offs[0:1].reshape(1, n, h, w)
    dx1 = offs[1:2].reshape(1, n, h, w)
    dy3 = offs[2::2].reshape(9, n, h, w)
    dx3 = offs[3::2].reshape(9, n, h, w)

    # ---------------- fused expand deform convs (both branches, one pallas_call) --------
    samp_e1 = bilinear_sample_patches_t(sc, dy1, dx1, k=1, pad=0)                     # [Csq, M]
    samp_e3 = bilinear_sample_patches_t(sc, dy3, dx3, k=3, pad=1)                     # [9*Csq, M]
    aT = jnp.concatenate([samp_e1, samp_e3], axis=0).astype(jnp.bfloat16)             # [10*Csq, M]
    outT = matmul_t_bias(prep["w_e"], aT, prep["b_e"], apply_relu=True)               # [E1+E3, M]

    # rows are already the channel-concat [expand1x1, expand3x3]; back to NCHW.
    return outT.reshape(cout, n, h, w).transpose(1, 0, 2, 3)


if __name__ == "__main__":
    key = jax.random.PRNGKey(0)
    kp, kx = jax.random.split(key)

    batch, in_channels, hw = 2, 4, 16
    channels, expand1x1_channels, expand3x3_channels = 4, 8, 8

    params = init_squeeze_block(kp, in_channels, channels,
                                expand1x1_channels, expand3x3_channels)
    prep = prepare_params(params)     # fused weights assembled once, outside the forward
    x = jax.random.normal(kx, (batch, in_channels, hw, hw), jnp.float32)

    fwd = jax.jit(squeeze_block_w_deform_conv)
    out = jax.block_until_ready(fwd(prep, x))

    expected = (batch, 2 * expand3x3_channels, hw, hw)
    assert out.shape == expected, (out.shape, expected)
    assert jnp.all(jnp.isfinite(out))
    print("KERNEL_OK")
</pallas_src>

<mosaic_0001>
module attributes {stable_mosaic.version = 11 : i64} {
  func.func private @main(%arg0: i32) attributes {dimension_semantics = [#tpu.dimension_semantics<core_parallel>], iteration_bounds = array<i64: 2>, tpu.core_type = #tpu.core_type<sc_scalar_subcore>, window_params = []} {
    return
  }
}

module attributes {stable_mosaic.version = 11 : i64} {
  func.func private @main(%arg0: i32) attributes {dimension_semantics = [#tpu.dimension_semantics<core_parallel>], iteration_bounds = array<i64: 2>, tpu.core_type = #tpu.core_type<sc_scalar_subcore>, window_params = []} {
    return
  }
}

module attributes {stable_mosaic.version = 11 : i64} {
  func.func @_mm_t_bias_act_kernel(%arg0: i32, %arg1: memref<2x4xbf16, #tpu.memory_space<vmem>>, %arg2: memref<4x512xbf16, #tpu.memory_space<vmem>>, %arg3: memref<2x1xf32, #tpu.memory_space<vmem>>, %arg4: memref<2x512xf32, #tpu.memory_space<vmem>>) attributes {dimension_semantics = [#tpu.dimension_semantics<parallel>], iteration_bounds = array<i64: 1>, scalar_prefetch = 0 : i64, scratch_operands = 0 : i64, tpu.core_type = #tpu.core_type<tc>, window_params = [{pipeline_mode = #tpu.pipeline_mode<synchronous>, transform_indices = @transform_0, window_bounds = array<i64: 2, 4>}, {transform_indices = @transform_1, window_bounds = array<i64: 4, 512>}, {pipeline_mode = #tpu.pipeline_mode<synchronous>, transform_indices = @transform_2, window_bounds = array<i64: 2, 1>}, {transform_indices = @transform_3, window_bounds = array<i64: 2, 512>}]} {
    %c0 = arith.constant 0 : index
    %c0_0 = arith.constant 0 : index
    %0 = vector.load %arg1[%c0, %c0_0] : memref<2x4xbf16, #tpu.memory_space<vmem>>, vector<2x4xbf16>
    %c0_1 = arith.constant 0 : index
    %c0_2 = arith.constant 0 : index
    %1 = vector.load %arg2[%c0_1, %c0_2] : memref<4x512xbf16, #tpu.memory_space<vmem>>, vector<4x512xbf16>
    %cst = arith.constant dense<0.000000e+00> : vector<2x512xf32>
    %2 = tpu.matmul %0, %1, %cst {dimension_numbers = #tpu.dot_dimension_numbers<[1], [0], [0], [1], [0, 0, 1, 1], [], []>} : vector<2x4xbf16>, vector<4x512xbf16>, vector<2x512xf32> -> vector<2x512xf32>
    %c0_3 = arith.constant 0 : index
    %c0_4 = arith.constant 0 : index
    %3 = vector.load %arg3[%c0_3, %c0_4] : memref<2x1xf32, #tpu.memory_space<vmem>>, vector<2x1xf32>
    %4 = vector.broadcast %3 : vector<2x1xf32> to vector<2x512xf32>
    %5 = arith.addf %2, %4 : vector<2x512xf32>
    %c0_5 = arith.constant 0 : index
    %c0_6 = arith.constant 0 : index
    %6 = vector.load %arg4[%c0_5, %c0_6] : memref<2x512xf32, #tpu.memory_space<vmem>>, vector<2x512xf32>
    tpu.vector_store %arg4[%c0_5, %c0_6], %5 {strides = array<i32>} : memref<2x512xf32, #tpu.memory_space<vmem>>, vector<2x512xf32>,
    return
  }
  func.func @transform_0(%arg0: i32) -> (i32, i32) {
    %c0_i32 = arith.constant 0 : i32
    %c0_i32_0 = arith.constant 0 : i32
    %c0_i32_1 = arith.constant 0 : i32
    return %c0_i32, %c0_i32_0 : i32, i32
  }
  func.func @transform_1(%arg0: i32) -> (i32, i32) {
    %c0_i32 = arith.constant 0 : i32
    %c0_i32_0 = arith.constant 0 : i32
    return %c0_i32, %arg0 : i32, i32
  }
  func.func @transform_2(%arg0: i32) -> (i32, i32) {
    %c0_i32 = arith.constant 0 : i32
    %c0_i32_0 = arith.constant 0 : i32
    %c0_i32_1 = arith.constant 0 : i32
    return %c0_i32, %c0_i32_0 : i32, i32
  }
  func.func @transform_3(%arg0: i32) -> (i32, i32) {
    %c0_i32 = arith.constant 0 : i32
    %c0_i32_0 = arith.constant 0 : i32
    return %c0_i32, %arg0 : i32, i32
  }
}

module attributes {stable_mosaic.version = 11 : i64} {
  func.func @_mm_t_bias_act_kernel(%arg0: i32, %arg1: memref<4x4xbf16, #tpu.memory_space<vmem>>, %arg2: memref<4x512xbf16, #tpu.memory_space<vmem>>, %arg3: memref<4x1xf32, #tpu.memory_space<vmem>>, %arg4: memref<4x512xf32, #tpu.memory_space<vmem>>) attributes {dimension_semantics = [#tpu.dimension_semantics<parallel>], iteration_bounds = array<i64: 1>, scalar_prefetch = 0 : i64, scratch_operands = 0 : i64, tpu.core_type = #tpu.core_type<tc>, window_params = [{pipeline_mode = #tpu.pipeline_mode<synchronous>, transform_indices = @transform_0, window_bounds = array<i64: 4, 4>}, {transform_indices = @transform_1, window_bounds = array<i64: 4, 512>}, {pipeline_mode = #tpu.pipeline_mode<synchronous>, transform_indices = @transform_2, window_bounds = array<i64: 4, 1>}, {transform_indices = @transform_3, window_bounds = array<i64: 4, 512>}]} {
    %c0 = arith.constant 0 : index
    %c0_0 = arith.constant 0 : index
    %0 = vector.load %arg1[%c0, %c0_0] : memref<4x4xbf16, #tpu.memory_space<vmem>>, vector<4x4xbf16>
    %c0_1 = arith.constant 0 : index
    %c0_2 = arith.constant 0 : index
    %1 = vector.load %arg2[%c0_1, %c0_2] : memref<4x512xbf16, #tpu.memory_space<vmem>>, vector<4x512xbf16>
    %cst = arith.constant dense<0.000000e+00> : vector<4x512xf32>
    %2 = tpu.matmul %0, %1, %cst {dimension_numbers = #tpu.dot_dimension_numbers<[1], [0], [0], [1], [0, 0, 1, 1], [], []>} : vector<4x4xbf16>, vector<4x512xbf16>, vector<4x512xf32> -> vector<4x512xf32>
    %c0_3 = arith.constant 0 : index
    %c0_4 = arith.constant 0 : index
    %3 = vector.load %arg3[%c0_3, %c0_4] : memref<4x1xf32, #tpu.memory_space<vmem>>, vector<4x1xf32>
    %4 = vector.broadcast %3 : vector<4x1xf32> to vector<4x512xf32>
    %5 = arith.addf %2, %4 : vector<4x512xf32>
    %cst_5 = arith.constant 0.000000e+00 : f32
    %6 = vector.broadcast %cst_5 : f32 to vector<4x512xf32>
    %7 = arith.maximumf %5, %6 : vector<4x512xf32>
    %c0_6 = arith.constant 0 : index
    %c0_7 = arith.constant 0 : index
    %8 = vector.load %arg4[%c0_6, %c0_7] : memref<4x512xf32, #tpu.memory_space<vmem>>, vector<4x512xf32>
    tpu.vector_store %arg4[%c0_6, %c0_7], %7 {strides = array<i32>} : memref<4x512xf32, #tpu.memory_space<vmem>>, vector<4x512xf32>,
    return
  }
  func.func @transform_0(%arg0: i32) -> (i32, i32) {
    %c0_i32 = arith.constant 0 : i32
    %c0_i32_0 = arith.constant 0 : i32
    %c0_i32_1 = arith.constant 0 : i32
    return %c0_i32, %c0_i32_0 : i32, i32
  }
  func.func @transform_1(%arg0: i32) -> (i32, i32) {
    %c0_i32 = arith.constant 0 : i32
    %c0_i32_0 = arith.constant 0 : i32
    return %c0_i32, %arg0 : i32, i32
  }
  func.func @transform_2(%arg0: i32) -> (i32, i32) {
    %c0_i32 = arith.constant 0 : i32
    %c0_i32_0 = arith.constant 0 : i32
    %c0_i32_1 = arith.constant 0 : i32
    return %c0_i32, %c0_i32_0 : i32, i32
  }
  func.func @transform_3(%arg0: i32) -> (i32, i32) {
    %c0_i32 = arith.constant 0 : i32
    %c0_i32_0 = arith.constant 0 : i32
    return %c0_i32, %arg0 : i32, i32
  }
}

module attributes {stable_mosaic.version = 11 : i64} {
  func.func @_mm_t_bias_act_kernel(%arg0: i32, %arg1: memref<20x36xbf16, #tpu.memory_space<vmem>>, %arg2: memref<36x512xbf16, #tpu.memory_space<vmem>>, %arg3: memref<20x1xf32, #tpu.memory_space<vmem>>, %arg4: memref<20x512xf32, #tpu.memory_space<vmem>>) attributes {dimension_semantics = [#tpu.dimension_semantics<parallel>], iteration_bounds = array<i64: 1>, scalar_prefetch = 0 : i64, scratch_operands = 0 : i64, tpu.core_type = #tpu.core_type<tc>, window_params = [{pipeline_mode = #tpu.pipeline_mode<synchronous>, transform_indices = @transform_0, window_bounds = array<i64: 20, 36>}, {transform_indices = @transform_1, window_bounds = array<i64: 36, 512>}, {pipeline_mode = #tpu.pipeline_mode<synchronous>, transform_indices = @transform_2, window_bounds = array<i64: 20, 1>}, {transform_indices = @transform_3, window_bounds = array<i64: 20, 512>}]} {
    %c0 = arith.constant 0 : index
    %c0_0 = arith.constant 0 : index
    %0 = vector.load %arg1[%c0, %c0_0] : memref<20x36xbf16, #tpu.memory_space<vmem>>, vector<20x36xbf16>
    %c0_1 = arith.constant 0 : index
    %c0_2 = arith.constant 0 : index
    %1 = vector.load %arg2[%c0_1, %c0_2] : memref<36x512xbf16, #tpu.memory_space<vmem>>, vector<36x512xbf16>
    %cst = arith.constant dense<0.000000e+00> : vector<20x512xf32>
    %2 = tpu.matmul %0, %1, %cst {dimension_numbers = #tpu.dot_dimension_numbers<[1], [0], [0], [1], [0, 0, 1, 1], [], []>} : vector<20x36xbf16>, vector<36x512xbf16>, vector<20x512xf32> -> vector<20x512xf32>
    %c0_3 = arith.constant 0 : index
    %c0_4 = arith.constant 0 : index
    %3 = vector.load %arg3[%c0_3, %c0_4] : memref<20x1xf32, #tpu.memory_space<vmem>>, vector<20x1xf32>
    %4 = vector.broadcast %3 : vector<20x1xf32> to vector<20x512xf32>
    %5 = arith.addf %2, %4 : vector<20x512xf32>
    %c0_5 = arith.constant 0 : index
    %c0_6 = arith.constant 0 : index
    %6 = vector.load %arg4[%c0_5, %c0_6] : memref<20x512xf32, #tpu.memory_space<vmem>>, vector<20x512xf32>
    tpu.vector_store %arg4[%c0_5, %c0_6], %5 {strides = array<i32>} : memref<20x512xf32, #tpu.memory_space<vmem>>, vector<20x512xf32>,
    return
  }
  func.func @transform_0(%arg0: i32) -> (i32, i32) {
    %c0_i32 = arith.constant 0 : i32
    %c0_i32_0 = arith.constant 0 : i32
    %c0_i32_1 = arith.constant 0 : i32
    return %c0_i32, %c0_i32_0 : i32, i32
  }
  func.func @transform_1(%arg0: i32) -> (i32, i32) {
    %c0_i32 = arith.constant 0 : i32
    %c0_i32_0 = arith.constant 0 : i32
    return %c0_i32, %arg0 : i32, i32
  }
  func.func @transform_2(%arg0: i32) -> (i32, i32) {
    %c0_i32 = arith.constant 0 : i32
    %c0_i32_0 = arith.constant 0 : i32
    %c0_i32_1 = arith.constant 0 : i32
    return %c0_i32, %c0_i32_0 : i32, i32
  }
  func.func @transform_3(%arg0: i32) -> (i32, i32) {
    %c0_i32 = arith.constant 0 : i32
    %c0_i32_0 = arith.constant 0 : i32
    return %c0_i32, %arg0 : i32, i32
  }
}

module attributes {stable_mosaic.version = 11 : i64} {
  func.func @_mm_t_bias_act_kernel(%arg0: i32, %arg1: memref<16x40xbf16, #tpu.memory_space<vmem>>, %arg2: memref<40x512xbf16, #tpu.memory_space<vmem>>, %arg3: memref<16x1xf32, #tpu.memory_space<vmem>>, %arg4: memref<16x512xf32, #tpu.memory_space<vmem>>) attributes {dimension_semantics = [#tpu.dimension_semantics<parallel>], iteration_bounds = array<i64: 1>, scalar_prefetch = 0 : i64, scratch_operands = 0 : i64, tpu.core_type = #tpu.core_type<tc>, window_params = [{pipeline_mode = #tpu.pipeline_mode<synchronous>, transform_indices = @transform_0, window_bounds = array<i64: 16, 40>}, {transform_indices = @transform_1, window_bounds = array<i64: 40, 512>}, {pipeline_mode = #tpu.pipeline_mode<synchronous>, transform_indices = @transform_2, window_bounds = array<i64: 16, 1>}, {transform_indices = @transform_3, window_bounds = array<i64: 16, 512>}]} {
    %c0 = arith.constant 0 : index
    %c0_0 = arith.constant 0 : index
    %0 = vector.load %arg1[%c0, %c0_0] : memref<16x40xbf16, #tpu.memory_space<vmem>>, vector<16x40xbf16>
    %c0_1 = arith.constant 0 : index
    %c0_2 = arith.constant 0 : index
    %1 = vector.load %arg2[%c0_1, %c0_2] : memref<40x512xbf16, #tpu.memory_space<vmem>>, vector<40x512xbf16>
    %cst = arith.constant dense<0.000000e+00> : vector<16x512xf32>
    %2 = tpu.matmul %0, %1, %cst {dimension_numbers = #tpu.dot_dimension_numbers<[1], [0], [0], [1], [0, 0, 1, 1], [], []>} : vector<16x40xbf16>, vector<40x512xbf16>, vector<16x512xf32> -> vector<16x512xf32>
    %c0_3 = arith.constant 0 : index
    %c0_4 = arith.constant 0 : index
    %3 = vector.load %arg3[%c0_3, %c0_4] : memref<16x1xf32, #tpu.memory_space<vmem>>, vector<16x1xf32>
    %4 = vector.broadcast %3 : vector<16x1xf32> to vector<16x512xf32>
    %5 = arith.addf %2, %4 : vector<16x512xf32>
    %cst_5 = arith.constant 0.000000e+00 : f32
    %6 = vector.broadcast %cst_5 : f32 to vector<16x512xf32>
    %7 = arith.maximumf %5, %6 : vector<16x512xf32>
    %c0_6 = arith.constant 0 : index
    %c0_7 = arith.constant 0 : index
    %8 = vector.load %arg4[%c0_6, %c0_7] : memref<16x512xf32, #tpu.memory_space<vmem>>, vector<16x512xf32>
    tpu.vector_store %arg4[%c0_6, %c0_7], %7 {strides = array<i32>} : memref<16x512xf32, #tpu.memory_space<vmem>>, vector<16x512xf32>,
    return
  }
  func.func @transform_0(%arg0: i32) -> (i32, i32) {
    %c0_i32 = arith.constant 0 : i32
    %c0_i32_0 = arith.constant 0 : i32
    %c0_i32_1 = arith.constant 0 : i32
    return %c0_i32, %c0_i32_0 : i32, i32
  }
  func.func @transform_1(%arg0: i32) -> (i32, i32) {
    %c0_i32 = arith.constant 0 : i32
    %c0_i32_0 = arith.constant 0 : i32
    return %c0_i32, %arg0 : i32, i32
  }
  func.func @transform_2(%arg0: i32) -> (i32, i32) {
    %c0_i32 = arith.constant 0 : i32
    %c0_i32_0 = arith.constant 0 : i32
    %c0_i32_1 = arith.constant 0 : i32
    return %c0_i32, %c0_i32_0 : i32, i32
  }
  func.func @transform_3(%arg0: i32) -> (i32, i32) {
    %c0_i32 = arith.constant 0 : i32
    %c0_i32_0 = arith.constant 0 : i32
    return %c0_i32, %arg0 : i32, i32
  }
}

</mosaic_0001>

<bundles_post_ra>
// kernel: squeeze_block_w_deform_conv.4
= control target key start
LH: loop header
LB: loop body
LE: loop exit
PB: predicated region body
PF: predicated region fallthrough
CT: control target
= control target key end

     0   :  { %v28_v0 = vlaneseq  ;;  %v175_v2 = vmov 1983009808   ;;  %v176_v4 = vmov 0   ;;  %vm45_vm0 = vcmask 1041408   ;;  %s209_s1 = inlined_call_operand.vmem [shape: bf16[4,512], index: 1, kind: input, shape index: {}]   ;;  %s210_s2 = inlined_call_operand.vmem [shape: f32[2,1], index: 2, kind: input, shape index: {}]   ;;  %s211_s0 = inlined_call_operand.vmem [shape: bf16[2,4], index: 0, kind: input, shape index: {}]   ;;  %s212_s3 = inlined_call_operand.vmem [shape: f32[2,512], index: 3, kind: output, shape index: {}]  }
   0x1   :  { %v16_v1 = vld [vmem:[%s209_s1] sm:$0xff]  ;;  %v26_v3 = vunpack.c.l.s4 %v175_v2  ;;  %90 = vmatprep.mubr.bf16.mxu0 %v176_v4  ;;  %131 = vmatprep.mubr.bf16.mxu1 %v176_v4  ;;  %vm41_vm1 = vcmask 31744  }
   0x2   :  { %v17_v5 = vld [vmem:[%s210_s2] sm:$0x3]  ;;  %v29_v6 = vshrl.u32 %v28_v0, 7  ;;  %173 = vset.pattern.permute.xlu0 %v176_v4  ;;  %v24_v8 = vcombine.high %v16_v1, %v16_v1 }
   0x3   :  { %v27_v7 = vunpack.c.0.s8 %v26_v3  ;;  %20 = vperm.xlu0 %173, %v17_v5   ;;  %v15_v16 = vld [vmem:[%s211_s0] sm:$0x1] }
   0x5   :  { %v30_v9 = vsub.s32 %v27_v7, %v29_v6 }
   0x7   :  { %v31_v10 = vrot.slane %v16_v1, %v30_v9  ;;  %v38_v11 = vrot.slane %v24_v8, %v30_v9 }
   0x9   :  { %v39_v12 = vcombine.high %v31_v10, %v31_v10  ;;  %v40_v13 = vcombine.high %v38_v11, %v38_v11  ;;  %v47_v14 = vsel %vm45_vm0, %v31_v10, 0  ;;  %v53_v15 = vsel %vm45_vm0, %v38_v11, 0 }
   0xb   :  { %167 = vmatprep.subr.msk.bf16.mxu0 %vm45_vm0, %v39_v12  ;;  %169 = vmatprep.subr.msk.bf16.mxu1 %vm45_vm0, %v40_v13 }
   0xc   :  { %59 = vmatpush1.bf16.msra.mxu0 %v47_v14  ;;  %100 = vmatpush1.bf16.msra.mxu1 %v53_v15 }
   0xf   :  { %168 = vmatmul.mubr.msk.bf16.vlgmr.msra.gmra.mrb[0].mxu0 %vm41_vm1, %v15_v16  ;;  %170 = vmatmul.mubr.msk.bf16.vlgmr.msra.gmra.mrb[0].mxu1 %vm41_vm1, %v15_v16 }
  0x82   :  { %v21_v17 = vpop.permute.xlu0 %20 }
  0xe2   :  { %v92_v18 = vpop.f32.mrb[0].mxu0  ;;  %v133_v19 = vpop.f32.mrb[0].mxu1 }
  0xe3   :  { %v93_v20 = vadd.f32 %v92_v18, %v21_v17  ;;  %v134_v21 = vadd.f32 %v133_v19, %v21_v17  ;;  %v94_v22 = vpop.f32.mrb[1].mxu0  ;;  %v135_v23 = vpop.f32.mrb[1].mxu1 }
  0xe4   :  { %v95_v24 = vadd.f32 %v94_v22, %v21_v17  ;;  %v136_v25 = vadd.f32 %v135_v23, %v21_v17  ;;  %v96_v26 = vpop.f32.mrb[2].mxu0  ;;  %v137_v27 = vpop.f32.mrb[2].mxu1 }
  0xe5   :  { %v97_v28 = vpop.f32.mrb[3].mxu0  ;;  %v138_v29 = vpop.f32.mrb[3].mxu1 }
  0xe6   :  { %v144_v30 = vcombine.low %v93_v20, %v95_v24  ;;  %v145_v31 = vcombine.low %v134_v21, %v136_v25 }
  0xe8   :  { %v152_v32 = vrot.slane %v144_v30, %v30_v9  ;;  %v159_v33 = vrot.slane %v145_v31, %v30_v9 }
  0xea   :  { %v160_v34 = vcombine.low %v152_v32, %v159_v33 }
  0xec   :  { %162 = vst [vmem:[%s212_s3] sm:$0xff] %v160_v34 }

// kernel: squeeze_block_w_deform_conv.5
= control target key start
LH: loop header
LB: loop body
LE: loop exit
PB: predicated region body
PF: predicated region fallthrough
CT: control target
= control target key end

     0   :  { %v28_v0 = vlaneseq  ;;  %v166_v2 = vmov 1983009808   ;;  %v167_v4 = vmov 0   ;;  %vm45_vm0 = vcmask 1041408   ;;  %s203_s1 = inlined_call_operand.vmem [shape: bf16[4,512], index: 1, kind: input, shape index: {}]   ;;  %s204_s2 = inlined_call_operand.vmem [shape: f32[4,1], index: 2, kind: input, shape index: {}]   ;;  %s205_s0 = inlined_call_operand.vmem [shape: bf16[4,4], index: 0, kind: input, shape index: {}]   ;;  %s206_s3 = inlined_call_operand.vmem [shape: f32[4,512], index: 3, kind: output, shape index: {}]  }
   0x1   :  { %v16_v1 = vld [vmem:[%s203_s1] sm:$0xff]  ;;  %v26_v3 = vunpack.c.l.s4 %v166_v2  ;;  %90 = vmatprep.mubr.bf16.mxu0 %v167_v4  ;;  %131 = vmatprep.mubr.bf16.mxu1 %v167_v4  ;;  %vm41_vm1 = vcmask 31744  }
   0x2   :  { %v17_v5 = vld [vmem:[%s204_s2] sm:$0xf]  ;;  %v29_v6 = vshrl.u32 %v28_v0, 7  ;;  %164 = vset.pattern.permute.xlu0 %v167_v4  ;;  %v24_v8 = vcombine.high %v16_v1, %v16_v1 }
   0x3   :  { %v27_v7 = vunpack.c.0.s8 %v26_v3  ;;  %20 = vperm.xlu0 %164, %v17_v5   ;;  %v15_v16 = vld [vmem:[%s205_s0] sm:$0x3] }
   0x5   :  { %v30_v9 = vsub.s32 %v27_v7, %v29_v6 }
   0x7   :  { %v31_v10 = vrot.slane %v16_v1, %v30_v9  ;;  %v38_v11 = vrot.slane %v24_v8, %v30_v9 }
   0x9   :  { %v39_v12 = vcombine.high %v31_v10, %v31_v10  ;;  %v40_v13 = vcombine.high %v38_v11, %v38_v11  ;;  %v47_v14 = vsel %vm45_vm0, %v31_v10, 0  ;;  %v53_v15 = vsel %vm45_vm0, %v38_v11, 0 }
   0xb   :  { %158 = vmatprep.subr.msk.bf16.mxu0 %vm45_vm0, %v39_v12  ;;  %160 = vmatprep.subr.msk.bf16.mxu1 %vm45_vm0, %v40_v13 }
   0xc   :  { %59 = vmatpush1.bf16.msra.mxu0 %v47_v14  ;;  %100 = vmatpush1.bf16.msra.mxu1 %v53_v15 }
   0xf   :  { %159 = vmatmul.mubr.msk.bf16.vlgmr.msra.gmra.mrb[0].mxu0 %vm41_vm1, %v15_v16  ;;  %161 = vmatmul.mubr.msk.bf16.vlgmr.msra.gmra.mrb[0].mxu1 %vm41_vm1, %v15_v16 }
  0x82   :  { %v21_v17 = vpop.permute.xlu0 %20 }
  0xe2   :  { %v92_v18 = vpop.f32.mrb[0].mxu0  ;;  %v133_v19 = vpop.f32.mrb[0].mxu1 }
  0xe3   :  { %v93_v20 = vadd.f32 %v92_v18, %v21_v17  ;;  %v134_v21 = vadd.f32 %v133_v19, %v21_v17  ;;  %v94_v22 = vpop.f32.mrb[1].mxu0  ;;  %v135_v23 = vpop.f32.mrb[1].mxu1 }
  0xe4   :  { %v95_v24 = vadd.f32 %v94_v22, %v21_v17  ;;  %v136_v25 = vadd.f32 %v135_v23, %v21_v17  ;;  %v96_v26 = vpop.f32.mrb[2].mxu0  ;;  %v137_v27 = vpop.f32.mrb[2].mxu1 }
  0xe5   :  { %v140_v28 = vmax.f32 %v93_v20, 0.0  ;;  %v142_v29 = vmax.f32 %v134_v21, 0.0  ;;  %v97_v30 = vpop.f32.mrb[3].mxu0  ;;  %v138_v31 = vpop.f32.mrb[3].mxu1 }
  0xe6   :  { %v141_v32 = vmax.f32 %v95_v24, 0.0  ;;  %v143_v33 = vmax.f32 %v136_v25, 0.0 }
  0xe8   :  { %v148_v34 = vcombine.low %v140_v28, %v141_v32  ;;  %v149_v35 = vcombine.low %v142_v29, %v143_v33 }
  0xea   :  { %152 = vst [vmem:[%s206_s3] sm:$0xff] %v148_v34  ;;  %153 = vst [vmem:[%s206_s3 + $0x8] sm:$0xff] %v149_v35 }

// kernel: squeeze_block_w_deform_conv.6
= control target key start
LH: loop header
LB: loop body
LE: loop exit
PB: predicated region body
PF: predicated region fallthrough
CT: control target
= control target key end

     0   :  { %v283_v1 = vmov 0   ;;  %vm111_vm0 = vcmask 1041408   ;;  %vm104_vm1 = vcmask 293888   ;;  %s389_s1 = inlined_call_operand.vmem [shape: bf16[36,512], index: 1, kind: input, shape index: {}]   ;;  %s390_s2 = inlined_call_operand.vmem [shape: f32[20,1], index: 2, kind: input, shape index: {}]   ;;  %s391_s0 = inlined_call_operand.vmem [shape: bf16[20,36], index: 0, kind: input, shape index: {}]   ;;  %s392_s3 = inlined_call_operand.vmem [shape: f32[20,512], index: 3, kind: output, shape index: {}]  }
   0x1   :  { %v265_v0 = vld [vmem:[%s389_s1 + $0x4] ss:$16 sps:$4 sm:$0xff]   ;;  %156 = vmatprep.mubr.bf16.mxu0 %v283_v1  ;;  %207 = vmatprep.mubr.bf16.mxu1 %v283_v1  ;;  %v267_v2 = vld [vmem:[%s389_s1 + $0xc] ss:$16 sps:$4 sm:$0xff]   ;;  %v269_v3 = vld [vmem:[%s389_s1] ss:$16 sps:$4 sm:$0xff]  }
   0x2   :  { %263 = vset.pattern.permute.xlu0 %v283_v1  ;;  %264 = vset.pattern.permute.xlu1 %v283_v1  ;;  %v270_v4 = vld [vmem:[%s389_s1 + $0x8] ss:$16 sps:$4 sm:$0xff]   ;;  %v271_v5 = vld [vmem:[%s389_s1 + $0x24] ss:$16 sps:$4 sm:$0xff]   ;;  %v273_v6 = vld [vmem:[%s389_s1 + $0x2c] ss:$16 sps:$4 sm:$0xff]  }
   0x3   :  { %124 = vmatprep.subr.bf16.mxu0 %v265_v0  ;;  %175 = vmatprep.subr.bf16.mxu1 %v267_v2  ;;  %v275_v7 = vld [vmem:[%s389_s1 + $0x20] ss:$16 sps:$4 sm:$0xff]   ;;  %v276_v8 = vld [vmem:[%s389_s1 + $0x28] ss:$16 sps:$4 sm:$0xff]  }
   0x4   :  { %125 = vmatpush1.bf16.msra.mxu0 %v269_v3  ;;  %176 = vmatpush1.bf16.msra.mxu1 %v270_v4  ;;  %v26_v9 = vld [vmem:[%s389_s1 + $0x40] sm:$0x33]  ;;  %v27_v10 = vld [vmem:[%s389_s1 + $0x48] sm:$0x33]  ;;  %v30_v16 = vld [vmem:[%s390_s2 + $0x10] sm:$0xf] }
   0x5   :  { %126 = vmatprep.subr.bf16.mxu0 %v271_v5  ;;  %177 = vmatprep.subr.bf16.mxu1 %v273_v6  ;;  %v253_v11 = vcombine.high %v26_v9, %v26_v9  ;;  %v255_v12 = vcombine.high %v27_v10, %v27_v10  ;;  %v252_v13 = vcombine.low %v26_v9, %v26_v9  ;;  %v28_v15 = vld [vmem:[%s390_s2] sm:$0xff]  ;;  %v29_v20 = vld [vmem:[%s390_s2 + $0x8] sm:$0xff] }
   0x6   :  { %v254_v14 = vcombine.low %v27_v10, %v27_v10  ;;  %33 = vperm.xlu0 %263, %v28_v15   ;;  %43 = vperm.xlu1 %264, %v30_v16   ;;  %v281_v19 = vld [vmem:[%s391_s0] sm:$0xff]   ;;  %v282_v21 = vld [vmem:[%s391_s0 + $0x8] ss:$0 sps:$4 sm:$0x33]  }
   0x7   :  { %v113_v17 = vsel %vm111_vm0, %v252_v13, 0 }
   0x8   :  { %127 = vmatpush1.bf16.msra.mxu0 %v275_v7  ;;  %178 = vmatpush1.bf16.msra.mxu1 %v276_v8  ;;  %v119_v18 = vsel %vm111_vm0, %v254_v14, 0 }
   0x9   :  { %256 = vmatprep.subr.msk.bf16.mxu0 %vm111_vm0, %v253_v11  ;;  %259 = vmatprep.subr.msk.bf16.mxu1 %vm111_vm0, %v255_v12 }
   0xa   :  { %38 = vperm.xlu0 %263, %v29_v20  }
   0xc   :  { %129 = vmatpush1.bf16.msra.mxu0 %v113_v17  ;;  %180 = vmatpush1.bf16.msra.mxu1 %v119_v18 }
   0xf   :  { %257 = vmatmul.mubr.msk.bf16.vlgmr.msra.gmra.mrb[0].mxu0 %vm104_vm1, %v281_v19  ;;  %260 = vmatmul.mubr.msk.bf16.vlgmr.msra.gmra.mrb[0].mxu1 %vm104_vm1, %v281_v19 }
  0x10   :  { %166 = vmatprep.mubr.bf16.mxu0 %v283_v1  ;;  %217 = vmatprep.mubr.bf16.mxu1 %v283_v1 }
  0x17   :  { %258 = vmatmul.mubr.msk.bf16.gmra.mrb[4].mxu0 %vm104_vm1, %v282_v21  ;;  %261 = vmatmul.mubr.msk.bf16.gmra.mrb[4].mxu1 %vm104_vm1, %v282_v21 }
  0x85   :  { %v34_v22 = vpop.permute.xlu0 %33  ;;  %v44_v40 = vpop.permute.xlu1 %43 }
  0x89   :  { %v39_v23 = vpop.permute.xlu0 %38 }
  0xe2   :  { %v158_v24 = vpop.f32.mrb[0].mxu0  ;;  %v209_v25 = vpop.f32.mrb[0].mxu1 }
  0xe3   :  { %v159_v26 = vadd.f32 %v158_v24, %v34_v22  ;;  %v210_v27 = vadd.f32 %v209_v25, %v34_v22  ;;  %v160_v28 = vpop.f32.mrb[1].mxu0  ;;  %v211_v29 = vpop.f32.mrb[1].mxu1 }
  0xe4   :  { %v161_v30 = vadd.f32 %v160_v28, %v34_v22  ;;  %v212_v31 = vadd.f32 %v211_v29, %v34_v22  ;;  %v162_v32 = vpop.f32.mrb[2].mxu0  ;;  %v213_v33 = vpop.f32.mrb[2].mxu1 }
  0xe5   :  { %226 = vst [vmem:[%s392_s3] sm:$0xff] %v159_v26  ;;  %228 = vst [vmem:[%s392_s3 + $0x10] sm:$0xff] %v210_v27  ;;  %v163_v34 = vadd.f32 %v162_v32, %v39_v23  ;;  %v214_v35 = vadd.f32 %v213_v33, %v39_v23  ;;  %v164_v36 = vpop.f32.mrb[3].mxu0  ;;  %v215_v37 = vpop.f32.mrb[3].mxu1 }
  0xe6   :  { %227 = vst [vmem:[%s392_s3 + $0x8] sm:$0xff] %v161_v30  ;;  %229 = vst [vmem:[%s392_s3 + $0x18] sm:$0xff] %v212_v31  ;;  %v165_v38 = vadd.f32 %v164_v36, %v39_v23  ;;  %v216_v39 = vadd.f32 %v215_v37, %v39_v23 }
  0xe7   :  { %230 = vst [vmem:[%s392_s3 + $0x20] sm:$0xff] %v163_v34  ;;  %232 = vst [vmem:[%s392_s3 + $0x30] sm:$0xff] %v214_v35 }
  0xe8   :  { %231 = vst [vmem:[%s392_s3 + $0x28] sm:$0xff] %v165_v38  ;;  %233 = vst [vmem:[%s392_s3 + $0x38] sm:$0xff] %v216_v39 }
  0xea   :  { %v168_v41 = vpop.f32.mrb[4].mxu0  ;;  %v219_v42 = vpop.f32.mrb[4].mxu1 }
  0xeb   :  { %v169_v43 = vadd.f32 %v168_v41, %v44_v40  ;;  %v220_v44 = vadd.f32 %v219_v42, %v44_v40  ;;  %v170_v45 = vpop.f32.mrb[5].mxu0  ;;  %v221_v46 = vpop.f32.mrb[5].mxu1 }
  0xec   :  { %v171_v47 = vadd.f32 %v170_v45, %v44_v40  ;;  %v222_v48 = vadd.f32 %v221_v46, %v44_v40  ;;  %v172_v49 = vpop.f32.mrb[6].mxu0  ;;  %v223_v50 = vpop.f32.mrb[6].mxu1 }
  0xed   :  { %234 = vst [vmem:[%s392_s3 + $0x40] sm:$0xf] %v169_v43  ;;  %236 = vst [vmem:[%s392_s3 + $0x50] sm:$0xf] %v220_v44  ;;  %v173_v51 = vpop.f32.mrb[7].mxu0  ;;  %v224_v52 = vpop.f32.mrb[7].mxu1 }
  0xee   :  { %235 = vst [vmem:[%s392_s3 + $0x48] sm:$0xf] %v171_v47  ;;  %237 = vst [vmem:[%s392_s3 + $0x58] sm:$0xf] %v222_v48 }

// kernel: squeeze_block_w_deform_conv.7
= control target key start
LH: loop header
LB: loop body
LE: loop exit
PB: predicated region body
PF: predicated region fallthrough
CT: control target
= control target key end

     0   :  { %v253_v1 = vmov 0   ;;  %vm98_vm0 = vcmask 1043456   ;;  %vm94_vm1 = vcmask 326656   ;;  %s337_s1 = inlined_call_operand.vmem [shape: bf16[40,512], index: 1, kind: input, shape index: {}]   ;;  %s338_s2 = inlined_call_operand.vmem [shape: f32[16,1], index: 2, kind: input, shape index: {}]   ;;  %s339_s0 = inlined_call_operand.vmem [shape: bf16[16,40], index: 0, kind: input, shape index: {}]   ;;  %s340_s3 = inlined_call_operand.vmem [shape: f32[16,512], index: 3, kind: output, shape index: {}]  }
   0x1   :  { %v236_v0 = vld [vmem:[%s337_s1 + $0x4] ss:$16 sps:$4 sm:$0xff]   ;;  %143 = vmatprep.mubr.bf16.mxu0 %v253_v1  ;;  %186 = vmatprep.mubr.bf16.mxu1 %v253_v1  ;;  %v238_v2 = vld [vmem:[%s337_s1 + $0xc] ss:$16 sps:$4 sm:$0xff]   ;;  %v240_v3 = vld [vmem:[%s337_s1] ss:$16 sps:$4 sm:$0xff]  }
   0x2   :  { %235 = vset.pattern.permute.xlu0 %v253_v1  ;;  %111 = vmatprep.subr.bf16.mxu0 %v236_v0  ;;  %v241_v4 = vld [vmem:[%s337_s1 + $0x8] ss:$16 sps:$4 sm:$0xff]   ;;  %v242_v5 = vld [vmem:[%s337_s1 + $0x24] ss:$16 sps:$4 sm:$0xff]   ;;  %v244_v6 = vld [vmem:[%s337_s1 + $0x2c] ss:$16 sps:$4 sm:$0xff]  }
   0x3   :  { %154 = vmatprep.subr.bf16.mxu1 %v238_v2  ;;  %112 = vmatpush1.bf16.msra.mxu0 %v240_v3  ;;  %v246_v7 = vld [vmem:[%s337_s1 + $0x20] ss:$16 sps:$4 sm:$0xff]   ;;  %v247_v8 = vld [vmem:[%s337_s1 + $0x28] ss:$16 sps:$4 sm:$0xff]  }
   0x4   :  { %155 = vmatpush1.bf16.msra.mxu1 %v241_v4  ;;  %113 = vmatprep.subr.bf16.mxu0 %v242_v5  ;;  %v25_v9 = vld [vmem:[%s337_s1 + $0x40] sm:$0xff]  ;;  %v26_v10 = vld [vmem:[%s337_s1 + $0x48] sm:$0xff] }
   0x5   :  { %156 = vmatprep.subr.bf16.mxu1 %v244_v6  ;;  %v227_v11 = vcombine.high %v25_v9, %v25_v9  ;;  %v229_v12 = vcombine.high %v26_v10, %v26_v10  ;;  %v226_v13 = vcombine.low %v25_v9, %v25_v9  ;;  %v228_v14 = vcombine.low %v26_v10, %v26_v10  ;;  %v27_v15 = vld [vmem:[%s338_s2] sm:$0xff]  ;;  %v28_v19 = vld [vmem:[%s338_s2 + $0x8] sm:$0xff] }
   0x6   :  { %31 = vperm.xlu0 %235, %v27_v15   ;;  %v252_v18 = vld [vmem:[%s339_s0] sm:$0xff]  }
   0x7   :  { %114 = vmatpush1.bf16.msra.mxu0 %v246_v7  ;;  %v100_v16 = vsel %vm98_vm0, %v226_v13, 0  ;;  %v106_v17 = vsel %vm98_vm0, %v228_v14, 0 }
   0x8   :  { %157 = vmatpush1.bf16.msra.mxu1 %v247_v8  ;;  %230 = vmatprep.subr.msk.bf16.mxu0 %vm98_vm0, %v227_v11 }
   0x9   :  { %232 = vmatprep.subr.msk.bf16.mxu1 %vm98_vm0, %v229_v12 }
   0xa   :  { %36 = vperm.xlu0 %235, %v28_v19  }
   0xb   :  { %116 = vmatpush1.bf16.msra.mxu0 %v100_v16 }
   0xc   :  { %159 = vmatpush1.bf16.msra.mxu1 %v106_v17 }
   0xe   :  { %231 = vmatmul.mubr.msk.bf16.vlgmr.msra.gmra.mrb[0].mxu0 %vm94_vm1, %v252_v18 }
   0xf   :  { %233 = vmatmul.mubr.msk.bf16.vlgmr.msra.gmra.mrb[0].mxu1 %vm94_vm1, %v252_v18 }
  0x85   :  { %v32_v20 = vpop.permute.xlu0 %31 }
  0x89   :  { %v37_v21 = vpop.permute.xlu0 %36 }
  0xe1   :  { %v145_v22 = vpop.f32.mrb[0].mxu0 }
  0xe2   :  { %v188_v23 = vpop.f32.mrb[0].mxu1  ;;  %v146_v24 = vadd.f32 %v145_v22, %v32_v20  ;;  %v147_v26 = vpop.f32.mrb[1].mxu0 }
  0xe3   :  { %v189_v25 = vadd.f32 %v188_v23, %v32_v20  ;;  %v190_v27 = vpop.f32.mrb[1].mxu1  ;;  %v148_v28 = vadd.f32 %v147_v26, %v32_v20  ;;  %v149_v30 = vpop.f32.mrb[2].mxu0 }
  0xe4   :  { %v191_v29 = vadd.f32 %v190_v27, %v32_v20  ;;  %v192_v31 = vpop.f32.mrb[2].mxu1  ;;  %v197_v32 = vmax.f32 %v146_v24, 0.0  ;;  %v150_v34 = vadd.f32 %v149_v30, %v37_v21  ;;  %v151_v36 = vpop.f32.mrb[3].mxu0 }
  0xe5   :  { %v199_v33 = vmax.f32 %v189_v25, 0.0  ;;  %v193_v35 = vadd.f32 %v192_v31, %v37_v21  ;;  %v194_v37 = vpop.f32.mrb[3].mxu1  ;;  %v198_v38 = vmax.f32 %v148_v28, 0.0  ;;  %v152_v40 = vadd.f32 %v151_v36, %v37_v21 }
  0xe6   :  { %v200_v39 = vmax.f32 %v191_v29, 0.0  ;;  %v195_v41 = vadd.f32 %v194_v37, %v37_v21  ;;  %205 = vst [vmem:[%s340_s3] sm:$0xff] %v197_v32  ;;  %v201_v42 = vmax.f32 %v150_v34, 0.0 }
  0xe7   :  { %207 = vst [vmem:[%s340_s3 + $0x10] sm:$0xff] %v199_v33  ;;  %v203_v43 = vmax.f32 %v193_v35, 0.0  ;;  %206 = vst [vmem:[%s340_s3 + $0x8] sm:$0xff] %v198_v38  ;;  %v202_v44 = vmax.f32 %v152_v40, 0.0 }
  0xe8   :  { %208 = vst [vmem:[%s340_s3 + $0x18] sm:$0xff] %v200_v39  ;;  %v204_v45 = vmax.f32 %v195_v41, 0.0  ;;  %209 = vst [vmem:[%s340_s3 + $0x20] sm:$0xff] %v201_v42 }
  0xe9   :  { %211 = vst [vmem:[%s340_s3 + $0x30] sm:$0xff] %v203_v43  ;;  %210 = vst [vmem:[%s340_s3 + $0x28] sm:$0xff] %v202_v44 }
  0xea   :  { %212 = vst [vmem:[%s340_s3 + $0x38] sm:$0xff] %v204_v45 }

</bundles_post_ra>
